<compile_context>
chip_gen: v6e
topology: v6e:2x2x1
jax: 0.10.0
libtpu: 0.0.40
codegen_flags: <defaults>
</compile_context>

<pallas_src>
import jax
import jax.numpy as jnp
from jax.experimental import pallas as pl
from jax.experimental.pallas import tpu as pltpu

B, H, C = 8, 32, 16          # batch, hidden, num classes (small demo shapes)
REG_COEF = 1e-4              # model.loss_reg = REG_COEF * sum(W**2)


def cal_loss_kernel(x_ref, w_ref, b_ref, labels_ref, loss_ref):
    # --- output = self.model(datax): linear projection on the MXU ---
    x = x_ref[...]                                       # [B, H] f32 (VMEM)
    w = w_ref[...]                                       # [H, C] f32 (VMEM)
    logits = jnp.dot(x, w, preferred_element_type=jnp.float32) + b_ref[...]  # [B, C]

    # --- CrossEntropyLoss(output, labels): log-softmax + NLL, mean over batch ---
    m = jnp.max(logits, axis=-1, keepdims=True)                       # [B, 1]
    shifted = logits - m                                              # [B, C]
    lse = jnp.log(jnp.sum(jnp.exp(shifted), axis=-1, keepdims=True))  # [B, 1]

    # Vectorized label pick: labels are a [B, 1] int32 column in VMEM; one
    # compare + select + row-reduce over the single [B, C] vreg tile (no
    # per-row scalar loads, no materialized one-hot matmul).
    labels_col = labels_ref[...]                                      # [B, 1] int32
    iota_c = jax.lax.broadcasted_iota(jnp.int32, (B, C), 1)           # [B, C]
    picked = jnp.sum(jnp.where(iota_c == labels_col, shifted, 0.0),
                     axis=-1, keepdims=True)                          # [B, 1]

    # Fused reduction: per-row nll, then a single cross-lane sum.
    nll = lse - picked                                                # [B, 1]
    ce = jnp.sum(nll) / jnp.float32(B)

    # --- cal_loss_reg_recursize (loss_mode == 'train'): loss + model.loss_reg ---
    # W is already resident in VMEM for the matmul; no second HBM pass.
    loss_reg = REG_COEF * jnp.sum(w * w)

    # Scalar loss -> SMEM output (avoids lane-sparse masked VMEM store).
    loss_ref[0] = ce + loss_reg

    # TODO(synk): other loss_flag branches (masked_cross_entropy, mse_loss*, posi*_loss,
    # senti_auto_loss), ignore_index handling, and arbitrary submodel recursion are
    # config-dependent dispatch, not implemented in this synthetic kernel instantiation.


def cal_loss_forward(datax, labels, w, b):
    """CAL_LOSS.forward(datax, labels) -> scalar loss (shape (1,) f32)."""
    labels_col = labels.astype(jnp.int32).reshape(B, 1)  # [B, 1] int32 (VMEM column)
    b2d = b.astype(jnp.float32).reshape(1, C)

    cost = pl.CostEstimate(
        flops=2 * B * H * C + 8 * B * C,                 # matmul + softmax/select arithmetic
        transcendentals=B * C + B,                       # exp per logit + log per row
        bytes_accessed=(datax.size * datax.dtype.itemsize
                        + w.size * w.dtype.itemsize
                        + C * 4 + B * 4 + 4),
    )

    return pl.pallas_call(
        cal_loss_kernel,
        out_shape=jax.ShapeDtypeStruct((1,), jnp.float32),
        # No grid: the whole problem fits one invocation; a 1-point grid would
        # only add per-step pipeline prologue/epilogue overhead.
        in_specs=[
            pl.BlockSpec(memory_space=pltpu.MemorySpace.VMEM),   # datax  [B, H]
            pl.BlockSpec(memory_space=pltpu.MemorySpace.VMEM),   # W      [H, C]
            pl.BlockSpec(memory_space=pltpu.MemorySpace.VMEM),   # bias   [1, C]
            pl.BlockSpec(memory_space=pltpu.MemorySpace.VMEM),   # labels [B, 1] int32
        ],
        out_specs=pl.BlockSpec(memory_space=pltpu.MemorySpace.SMEM),
        cost_estimate=cost,
    )(datax, w, b2d, labels_col)


def ref_loss(datax, labels, w, b):
    """Pure-JAX reference mirroring torch.nn.CrossEntropyLoss + loss_reg."""
    logits = datax.astype(jnp.float32) @ w.astype(jnp.float32) + b.astype(jnp.float32)
    logp = jax.nn.log_softmax(logits, axis=-1)
    nll = -jnp.take_along_axis(logp, labels[:, None].astype(jnp.int32), axis=-1)
    return jnp.mean(nll) + REG_COEF * jnp.sum(w.astype(jnp.float32) ** 2)


if __name__ == "__main__":
    key = jax.random.PRNGKey(0)
    kx, kw, kb, kl = jax.random.split(key, 4)

    # Deterministic synthetic parameters for the inner model (linear head H -> C).
    w = jax.random.normal(kw, (H, C), dtype=jnp.float32) * 0.1
    b = jax.random.normal(kb, (C,), dtype=jnp.float32) * 0.01

    # Inputs.
    datax = jax.random.normal(kx, (B, H), dtype=jnp.float32)
    labels = jax.random.randint(kl, (B,), 0, C, dtype=jnp.int32)

    loss = jax.block_until_ready(cal_loss_forward(datax, labels, w, b))
    ref = jax.block_until_ready(ref_loss(datax, labels, w, b))
    assert jnp.allclose(loss[0], ref, rtol=1e-5, atol=1e-5), (loss, ref)

    print("KERNEL_OK")
</pallas_src>

<mosaic_0001>
module attributes {stable_mosaic.version = 11 : i64} {
  func.func @cal_loss_kernel(%arg0: memref<8x32xf32, #tpu.memory_space<vmem>>, %arg1: memref<32x16xf32, #tpu.memory_space<vmem>>, %arg2: memref<1x16xf32, #tpu.memory_space<vmem>>, %arg3: memref<8x1xi32, #tpu.memory_space<vmem>>, %arg4: memref<1xf32, #tpu.memory_space<smem>>) attributes {dimension_semantics = [], scalar_prefetch = 0 : i64, scratch_operands = 0 : i64, tpu.core_type = #tpu.core_type<tc>} {
    %c0 = arith.constant 0 : index
    %c0_0 = arith.constant 0 : index
    %0 = vector.load %arg0[%c0, %c0_0] : memref<8x32xf32, #tpu.memory_space<vmem>>, vector<8x32xf32>
    %c0_1 = arith.constant 0 : index
    %c0_2 = arith.constant 0 : index
    %1 = vector.load %arg1[%c0_1, %c0_2] : memref<32x16xf32, #tpu.memory_space<vmem>>, vector<32x16xf32>
    %cst = arith.constant dense<0.000000e+00> : vector<8x16xf32>
    %2 = tpu.matmul %0, %1, %cst {dimension_numbers = #tpu.dot_dimension_numbers<[1], [0], [0], [1], [0, 0, 1, 1], [], []>} : vector<8x32xf32>, vector<32x16xf32>, vector<8x16xf32> -> vector<8x16xf32>
    %c0_3 = arith.constant 0 : index
    %c0_4 = arith.constant 0 : index
    %3 = vector.load %arg2[%c0_3, %c0_4] : memref<1x16xf32, #tpu.memory_space<vmem>>, vector<1x16xf32>
    %4 = vector.broadcast %3 : vector<1x16xf32> to vector<8x16xf32>
    %5 = arith.addf %2, %4 : vector<8x16xf32>
    %cst_5 = arith.constant dense<0xFF800000> : vector<8xf32>
    %6 = vector.multi_reduction <maximumf>, %5, %cst_5 [1] : vector<8x16xf32> to vector<8xf32>
    %7 = vector.shape_cast %6 : vector<8xf32> to vector<8x1xf32>
    %8 = vector.broadcast %7 : vector<8x1xf32> to vector<8x16xf32>
    %9 = arith.subf %5, %8 : vector<8x16xf32>
    %10 = math.exp %9 : vector<8x16xf32>
    %cst_6 = arith.constant dense<0.000000e+00> : vector<8xf32>
    %11 = vector.multi_reduction <add>, %10, %cst_6 [1] : vector<8x16xf32> to vector<8xf32>
    %12 = vector.shape_cast %11 : vector<8xf32> to vector<8x1xf32>
    %13 = math.log %12 : vector<8x1xf32>
    %c0_7 = arith.constant 0 : index
    %c0_8 = arith.constant 0 : index
    %14 = vector.load %arg3[%c0_7, %c0_8] : memref<8x1xi32, #tpu.memory_space<vmem>>, vector<8x1xi32>
    %15 = tpu.iota {dimensions = array<i32: 1>} : vector<8x16xi32>
    %16 = vector.broadcast %14 : vector<8x1xi32> to vector<8x16xi32>
    %17 = arith.cmpi eq, %15, %16 : vector<8x16xi32>
    %cst_9 = arith.constant 0.000000e+00 : f32
    %18 = vector.broadcast %cst_9 : f32 to vector<8x16xf32>
    %19 = arith.select %17, %9, %18 : vector<8x16xi1>, vector<8x16xf32>
    %cst_10 = arith.constant dense<0.000000e+00> : vector<8xf32>
    %20 = vector.multi_reduction <add>, %19, %cst_10 [1] : vector<8x16xf32> to vector<8xf32>
    %21 = vector.shape_cast %20 : vector<8xf32> to vector<8x1xf32>
    %22 = arith.subf %13, %21 : vector<8x1xf32>
    %23 = vector.shape_cast %22 : vector<8x1xf32> to vector<1x8x1xf32>
    %cst_11 = arith.constant dense<0.000000e+00> : vector<1xf32>
    %24 = vector.multi_reduction <add>, %23, %cst_11 [1, 2] : vector<1x8x1xf32> to vector<1xf32>
    %25 = vector.shape_cast %24 : vector<1xf32> to vector<1x1x1xf32>
    %26 = vector.extract %25[0, 0, 0] : f32 from vector<1x1x1xf32>
    %cst_12 = arith.constant 8.000000e+00 : f32
    %27 = arith.divf %26, %cst_12 : f32
    %28 = arith.mulf %1, %1 : vector<32x16xf32>
    %29 = vector.shape_cast %28 : vector<32x16xf32> to vector<1x32x16xf32>
    %cst_13 = arith.constant dense<0.000000e+00> : vector<1xf32>
    %30 = vector.multi_reduction <add>, %29, %cst_13 [1, 2] : vector<1x32x16xf32> to vector<1xf32>
    %31 = vector.shape_cast %30 : vector<1xf32> to vector<1x1x1xf32>
    %32 = vector.extract %31[0, 0, 0] : f32 from vector<1x1x1xf32>
    %cst_14 = arith.constant 9.99999974E-5 : f32
    %33 = arith.mulf %cst_14, %32 : f32
    %34 = arith.addf %27, %33 : f32
    %c0_15 = arith.constant 0 : index
    %35 = memref.load %arg4[%c0_15] : memref<1xf32, #tpu.memory_space<smem>>
    memref.store %34, %arg4[%c0_15] : memref<1xf32, #tpu.memory_space<smem>>
    return
  }
}

</mosaic_0001>

<bundles_post_ra>
// kernel: tpu_custom_call.1
= control target key start
LH: loop header
LB: loop body
LE: loop exit
PB: predicated region body
PF: predicated region fallthrough
CT: control target
= control target key end

     0   :  { %v220_v1 = vmov 0.0   ;;  %vm221_vm0 = vmmov 0   ;;  %s280_s0 = inlined_call_operand.vmem [shape: f32[8,32], index: 0, kind: input, shape index: {}]   ;;  %s281_s1 = inlined_call_operand.vmem [shape: f32[32,16], index: 1, kind: input, shape index: {}]   ;;  %s282_s2 = inlined_call_operand.vmem [shape: f32[1,16], index: 2, kind: input, shape index: {}]   ;;  %s283_s3 = inlined_call_operand.vmem [shape: s32[8,1], index: 3, kind: input, shape index: {}]   ;;  %s284_s4 = inlined_call_operand.hbm [shape: f32[1], index: 4, kind: output, shape index: {}]  }
   0x1   :  { %v22_v0 = vld [vmem:[%s281_s1 + $0x18] sm:$0xff]  ;;  %186 = vmatprep.subr.mxu0 %v220_v1  ;;  %v21_v2 = vld [vmem:[%s281_s1 + $0x10] sm:$0xff]  ;;  %194 = vmatprep.mubr.msk.f32.mxu0 %vm221_vm0, %v220_v1 }
   0x2   :  { %187 = vmatpush3.msra.mxu0 %v22_v0 }
   0x3   :  { %9 = vsyncpa [#allocation3], 0  ;;  %188 = vmatprep.subr.mxu0 %v220_v1  ;;  %v20_v3 = vld [vmem:[%s281_s1 + $0x8] sm:$0xff]  ;;  %v19_v4 = vld [vmem:[%s281_s1] sm:$0xff]  ;;  %vm30_vm1 = vcmask 261120   ;;  %v222_v6 = vmov 0   ;;  %v117_v16 = vlaneseq  ;;  %v144_v25 = vmul.f32 %v21_v2, %v21_v2 }
   0x4   :  { %189 = vmatpush3.msra.mxu0 %v21_v2  ;;  %v18_v5 = vld [vmem:[%s280_s0] sm:$0xff]  ;;  %205 = vset.pattern.permute.xlu0 %v222_v6  ;;  %vm104_vm2 = vcmask 130048   ;;  %v143_v23 = vmul.f32 %v20_v3, %v20_v3  ;;  %v142_v24 = vmul.f32 %v19_v4, %v19_v4  ;;  %v145_v28 = vmul.f32 %v22_v0, %v22_v0  ;;  %s223_s30 = smov [#allocation2]  }
   0x5   :  { %190 = vmatprep.subr.mxu0 %v220_v1  ;;  %v179_v7 = vld [vmem:[%s282_s2] ss:$0 sm:$0xff]  ;;  %v118_v17 = vand.u32 127, %v117_v16  ;;  %v149_v30 = vsel %vm104_vm2, %v144_v25, 0.0  ;;  %vm128_vm4 = vcmask 7168  }
   0x6   :  { %191 = vmatpush3.msra.mxu0 %v20_v3  ;;  %v116_v12 = vld [vmem:[%s283_s3] sm:$0xff]  ;;  %v147_v26 = vsel %vm104_vm2, %v143_v23, 0.0  ;;  %v146_v27 = vsel %vm104_vm2, %v142_v24, 0.0  ;;  %v151_v32 = vsel %vm104_vm2, %v145_v28, 0.0 }
   0x7   :  { %192 = vmatprep.subr.mxu0 %v220_v1  ;;  %v148_v29 = vadd.f32 %v147_v26, %v146_v27 }
   0x8   :  { %193 = vmatpush3.msra.mxu0 %v19_v4 }
   0x9   :  { %195 = vmatmul.mubr.msk.f32.vlgmr.msra.gmra.mxu0 %vm30_vm1, %v18_v5  ;;  %v150_v31 = vadd.f32 %v149_v30, %v148_v29 }
   0xb   :  { %v152_v33 = vadd.f32 %v151_v32, %v150_v31 }
  0xc9   :  { %v100_v8 = vpop.f32.mrf.mxu0 }
  0xca   :  { %v101_v9 = vadd.f32 %v179_v7, %v100_v8 }
  0xcb   :  { %v196_v10 = vpop.f32.mrf.mxu0 }
  0xcc   :  { %v105_v11 = vsel %vm104_vm2, %v101_v9, -inf }
  0xcd   :  { %106 = vmax.xlane.f32.xlu0 %v105_v11 }
  0xe3   :  { %120 = vperm.xlu0 %205, %v116_v12  }
 0x156   :  { %v107_v13 = vpop.xlane.xlu0 %106 }
 0x157   :  { %v108_v14 = vsub.f32 %v101_v9, %v107_v13 }
 0x159   :  { %v109_v15 = vmul.f32 1.442695, %v108_v14 }
 0x15b   :  { %206 = vpow2.f32 %v109_v15 }
 0x15e   :  { %v121_v18 = vpop.permute.xlu0 %120 }
 0x15f   :  { %vm122_vm3 = vcmp.eq.s32.totalorder %v118_v17, %v121_v18 }
 0x160   :  { %v123_v21 = vsel %vm122_vm3, %v108_v14, 0.0 }
 0x161   :  { %v124_v22 = vsel %vm104_vm2, %v123_v21, 0.0 }
 0x168   :  { %v207_v19 = vpop.eup %206 }
 0x169   :  { %v111_v20 = vsel %vm104_vm2, %v207_v19, 0.0 }
 0x16a   :  { %112 = vadd.xlane.f32.xlu1 %v111_v20 }
 0x16e   :  { %125 = vadd.xlane.f32.xlu1 %v124_v22 }
 0x1f3   :  { %v113_v34 = vpop.xlane.xlu1 %112 }
 0x1f4   :  { %208 = vlog2.f32 %v113_v34 }
 0x1f7   :  { %v126_v37 = vpop.xlane.xlu1 %125 }
 0x201   :  { %v209_v35 = vpop.eup %208 }
 0x202   :  { %v115_v36 = vmul.f32 0.6931472, %v209_v35 }
 0x204   :  { %v127_v38 = vsub.f32 %v115_v36, %v126_v37 }
 0x206   :  { %v129_v39 = vsel %vm128_vm4, %v127_v38, 0.0 }
 0x207   :  { %130 = vadd.xlane.f32.xlu1 %v129_v39 }
 0x20b   :  { %153 = vadd.xlane.f32.xlu1 %v152_v33 }
 0x290   :  { %v131_v40 = vpop.xlane.xlu1 %130 }
 0x291   :  { %v132_v41 = vrot.slane %v131_v40, 4 }
 0x293   :  { %v133_v42 = vadd.f32 %v132_v41, %v131_v40 }
 0x294   :  { %v154_v43 = vpop.xlane.xlu1 %153 }
 0x295   :  { %v134_v44 = vrot.slane %v133_v42, 2  ;;  %v155_v45 = vrot.slane %v154_v43, 4 }
 0x297   :  { %v156_v46 = vadd.f32 %v155_v45, %v154_v43  ;;  %v135_v47 = vadd.f32 %v134_v44, %v133_v42 }
 0x299   :  { %v157_v48 = vrot.slane %v156_v46, 2  ;;  %v136_v49 = vrot.slane %v135_v47, 1 }
 0x29b   :  { %v158_v50 = vadd.f32 %v157_v48, %v156_v46  ;;  %v137_v51 = vadd.f32 %v136_v49, %v135_v47 }
 0x29d   :  { %197 = vpush %v137_v51  ;;  %v159_v52 = vrot.slane %v158_v50, 1 }
 0x29f   :  { %v160_v53 = vadd.f32 %v159_v52, %v158_v50 }
 0x2a1   :  { %199 = vpush %v160_v53 }
 0x2ce   :  { %s198_s0 = spop %197 }
 0x2cf   :  { %s141_s2 = smul.f32 0.125, %s198_s0 }
 0x2d2   :  { %s200_s3 = spop %199 }
 0x2d3   :  { %s162_s28 = smul.f32 0.0001, %s200_s3 }
 0x2d5   :  { %s163_s29 = sadd.f32 %s162_s28, %s141_s2 }
 0x2d7   :  { %165 = sst [smem:[#allocation2]] %s163_s29 }
 0x2d8   :  { %173 = dma.smem_to_hbm %s223_s30, 16, %s284_s4, [#allocation3]  }
 0x2d9   :  { %218 = dma.done.wait [#allocation3], 16  }
 0x2da   :  { %219 = vsyncadd [#allocation3], 4294967280 }
 0x2db   :  { %177 = sfence }
 0x2dc   :  { %178 = vsyncpa [#allocation3], 1 }

</bundles_post_ra>
